<compile_context>
chip_gen: v5e
topology: v5e:2x2
jax: 0.10.0
libtpu: 0.0.40
codegen_flags: <defaults>
</compile_context>

<pallas_src>
import functools

import jax
import jax.numpy as jnp
from jax.experimental import pallas as pl
from jax.experimental.pallas import tpu as pltpu


# ----------------------------- tiling helpers -------------------------------

_BLOCK_ROWS_MATMUL = 512     # M-tile for the conv matmul pass
_BLOCK_ROWS_ELTWISE = 1024   # M-tile for memory-bound passes
_N_CORE_SPLIT = 2            # leading "parallel" axis for v7x's 2 TensorCores


def _round_up(x, m):
    return (x + m - 1) // m * m


def _cdiv(a, b):
    return -(-a // b)


def _pick_vmem_limit():
    # v5e/v6e have 128 MiB physical VMEM; v7x only 64 MiB -> keep headroom.
    try:
        kind = jax.devices()[0].device_kind.lower()
    except Exception:
        return 32 * 1024 * 1024
    if "v7" in kind or "7x" in kind:
        return 40 * 1024 * 1024
    if "v5" in kind or "v6" in kind:
        return 80 * 1024 * 1024
    return 32 * 1024 * 1024


_VMEM_LIMIT = _pick_vmem_limit()


def _pad2d(a, rows, cols, dtype):
    r, c = a.shape
    return jnp.pad(a.astype(dtype), ((0, rows - r), (0, cols - c)))


def _divisor_tile(mp, block_rows):
    # largest multiple of 8 <= block_rows that divides mp (mp is a mult. of 8)
    tm = min(block_rows, mp)
    while mp % tm:
        tm -= 8
    return tm


# ----------------------------- Pallas kernels -------------------------------

def _matmul_bias_kernel(x_ref, w_ref, b_ref, o_ref):
    # ConvTranspose2d(k=2, s=2) == 4 fused 1x1 matmuls: out = x @ w + b
    acc = jnp.dot(x_ref[...], w_ref[...], preferred_element_type=jnp.float32)
    o_ref[...] = (acc + b_ref[...]).astype(o_ref.dtype)


def _conv_matmul_stats_kernel(p_ref, w_ref, y_ref, sum_ref, ssq_ref):
    # im2col conv matmul tile (bf16 store) + cross-tile accumulation of
    # per-channel sum / sum-of-squares (BN batch statistics) in f32.
    i = pl.program_id(1)

    @pl.when(i == 0)
    def _():
        sum_ref[...] = jnp.zeros_like(sum_ref)
        ssq_ref[...] = jnp.zeros_like(ssq_ref)

    y = jnp.dot(p_ref[...], w_ref[...], preferred_element_type=jnp.float32)
    y_ref[...] = y.astype(y_ref.dtype)
    # Fold the M tile into (tm//8, 8, N) and reduce the leading axis: pure
    # VALU vreg adds, unmasked (8, N) accumulator stores (no XLU, no masking).
    yr = y.reshape(y.shape[0] // 8, 8, y.shape[1])
    sum_ref[...] += jnp.sum(yr, axis=0)
    ssq_ref[...] += jnp.sum(yr * yr, axis=0)


def _scale_shift_relu_kernel(y_ref, s_ref, b_ref, o_ref):
    # BatchNorm (precomputed per-channel scale/shift) + ReLU, f32 math.
    y = y_ref[...].astype(jnp.float32)
    o_ref[...] = jnp.maximum(y * s_ref[...] + b_ref[...], 0.0).astype(o_ref.dtype)


# --------------------------- pallas_call wrappers ----------------------------

def matmul_bias(x, w, b, *, block_rows=_BLOCK_ROWS_ELTWISE):
    """(M,K) @ (K,N) + b -> bf16; M-tiled; K/N zero-padded lane-dense."""
    m, k = x.shape
    nout = w.shape[1]
    kp = _round_up(k, 128)
    np_ = _round_up(nout, 128)
    tm = min(block_rows, _round_up(m, 8))
    mp = _round_up(m, tm)

    xp = _pad2d(x, mp, kp, jnp.bfloat16)
    wp = _pad2d(w, kp, np_, jnp.bfloat16)
    bp = _pad2d(b.reshape(1, nout), 1, np_, jnp.float32)

    out = pl.pallas_call(
        _matmul_bias_kernel,
        out_shape=jax.ShapeDtypeStruct((mp, np_), jnp.bfloat16),
        grid=(mp // tm,),
        in_specs=[pl.BlockSpec((tm, kp), lambda i: (i, 0)),
                  pl.BlockSpec((kp, np_), lambda i: (0, 0)),
                  pl.BlockSpec((1, np_), lambda i: (0, 0))],
        out_specs=pl.BlockSpec((tm, np_), lambda i: (i, 0)),
        compiler_params=pltpu.CompilerParams(
            dimension_semantics=("parallel",),
            vmem_limit_bytes=_VMEM_LIMIT),
        cost_estimate=pl.CostEstimate(
            flops=2 * mp * kp * np_, transcendentals=0,
            bytes_accessed=mp * kp * 2 + kp * np_ * 2 + mp * np_ * 2),
    )(xp, wp, bp)
    return out[:m, :nout]


def conv_matmul_stats(p, w, *, block_rows=_BLOCK_ROWS_MATMUL):
    """im2col conv matmul (bf16 out) + per-channel f32 sum / sum-of-squares.

    Grid = (core_split, m_tile): the leading "parallel" axis splits M across
    the two TensorCores on v7x; each core accumulates into its own (8, N)
    stats block, and partials are combined in the wrapper.
    """
    m, k = p.shape
    nout = w.shape[1]
    kp = _round_up(k, 128)
    np_ = _round_up(nout, 128)
    tm = min(block_rows, _round_up(_cdiv(m, _N_CORE_SPLIT), 8))
    mp = _round_up(m, _N_CORE_SPLIT * tm)
    steps = mp // (_N_CORE_SPLIT * tm)

    pp = _pad2d(p, mp, kp, jnp.bfloat16)   # zero rows/cols -> zero conv output
    wp = _pad2d(w, kp, np_, jnp.bfloat16)

    # TODO(synk): K-tile the weight for real UNet channel counts on v7x (the
    # whole (kp, np_) weight is a single resident block here).
    y, s, ss = pl.pallas_call(
        _conv_matmul_stats_kernel,
        out_shape=(jax.ShapeDtypeStruct((mp, np_), jnp.bfloat16),
                   jax.ShapeDtypeStruct((_N_CORE_SPLIT * 8, np_), jnp.float32),
                   jax.ShapeDtypeStruct((_N_CORE_SPLIT * 8, np_), jnp.float32)),
        grid=(_N_CORE_SPLIT, steps),
        in_specs=[pl.BlockSpec((tm, kp), lambda c, i: (c * steps + i, 0)),
                  pl.BlockSpec((kp, np_), lambda c, i: (0, 0))],
        out_specs=(pl.BlockSpec((tm, np_), lambda c, i: (c * steps + i, 0)),
                   pl.BlockSpec((8, np_), lambda c, i: (c, 0)),   # per-core resident
                   pl.BlockSpec((8, np_), lambda c, i: (c, 0))),  # per-core resident
        compiler_params=pltpu.CompilerParams(
            dimension_semantics=("parallel", "arbitrary"),
            vmem_limit_bytes=_VMEM_LIMIT),
        cost_estimate=pl.CostEstimate(
            flops=2 * mp * kp * np_, transcendentals=0,
            bytes_accessed=mp * kp * 2 + kp * np_ * 2 + mp * np_ * 2),
    )(pp, wp)
    csum = jnp.sum(s, axis=0)    # combine the per-core (8, N) partials
    cssq = jnp.sum(ss, axis=0)
    return y, csum, cssq, np_


def scale_shift_relu(y_pad, scale, shift, *, block_rows=_BLOCK_ROWS_ELTWISE):
    mp, np_ = y_pad.shape
    tm = _divisor_tile(mp, block_rows)
    s2 = scale.reshape(1, np_).astype(jnp.float32)
    b2 = shift.reshape(1, np_).astype(jnp.float32)
    return pl.pallas_call(
        _scale_shift_relu_kernel,
        out_shape=jax.ShapeDtypeStruct((mp, np_), jnp.bfloat16),
        grid=(mp // tm,),
        in_specs=[pl.BlockSpec((tm, np_), lambda i: (i, 0)),
                  pl.BlockSpec((1, np_), lambda i: (0, 0)),
                  pl.BlockSpec((1, np_), lambda i: (0, 0))],
        out_specs=pl.BlockSpec((tm, np_), lambda i: (i, 0)),
        compiler_params=pltpu.CompilerParams(
            dimension_semantics=("parallel",),
            vmem_limit_bytes=_VMEM_LIMIT),
        cost_estimate=pl.CostEstimate(
            flops=2 * mp * np_, transcendentals=0,
            bytes_accessed=2 * mp * np_ * 2),
    )(y_pad, s2, b2)


# ------------------------------- JAX glue ------------------------------------

def conv3x3_bn_relu(x, conv_w, gamma, beta, *, eps=1e-5):
    """x: (N,H,W,Cin) NHWC.  conv_w: (Cout,Cin,3,3) PyTorch layout (bias=False)."""
    x = x.astype(jnp.bfloat16)
    n, h, w, cin = x.shape
    cout = conv_w.shape[0]
    m = n * h * w

    # replicate (edge) padding of 1 == padding_mode='replicate'
    xp = jnp.pad(x, ((0, 0), (1, 1), (1, 1), (0, 0)), mode="edge")
    # TODO(synk): move im2col inside the kernel (halo-tiled spatial blocks with
    # 9 shifted accumulating matmuls) to avoid materializing 9x patch bytes;
    # interim: patches are built in bf16 to halve that traffic.
    patches = [xp[:, kh:kh + h, kw:kw + w, :] for kh in range(3) for kw in range(3)]
    p = jnp.stack(patches, axis=3).reshape(m, 9 * cin)
    w_mat = jnp.transpose(conv_w, (2, 3, 1, 0)).reshape(9 * cin, cout)

    y_pad, csum, cssq, np_ = conv_matmul_stats(p, w_mat)

    # training-mode BN: batch statistics over all N*H*W pixels, biased variance
    # TODO(synk): E[x^2]-E[x]^2 in f32 can cancel for very large activations;
    # a shifted/two-pass combine would be more robust at real UNet scales.
    cnt = jnp.float32(m)
    mean = csum / cnt
    var = jnp.maximum(cssq / cnt - mean * mean, 0.0)
    gpad = jnp.pad(gamma.astype(jnp.float32), (0, np_ - cout))
    bpad = jnp.pad(beta.astype(jnp.float32), (0, np_ - cout))
    scale = gpad * jax.lax.rsqrt(var + eps)
    shift = bpad - mean * scale

    out = scale_shift_relu(y_pad, scale, shift)          # bf16
    return out[:m, :cout].reshape(n, h, w, cout)


def up_forward(x1_nchw, x2_nchw, params):
    """Pallas/JAX equivalent of Up.forward(x1, x2) with NCHW in/out."""
    x1 = jnp.transpose(x1_nchw, (0, 2, 3, 1)).astype(jnp.bfloat16)   # NHWC
    x2 = jnp.transpose(x2_nchw, (0, 2, 3, 1)).astype(jnp.bfloat16)   # NHWC
    n, h, w, cin = x1.shape
    cup = cin // 2

    # --- ConvTranspose2d(Cin, Cin//2, kernel_size=2, stride=2), with bias ---
    # out[n, 2i+di, 2j+dj, co] = sum_ci x[n,i,j,ci] * W[ci,co,di,dj] + b[co]
    up_w = params["up_w"]                                    # (Cin, Cup, 2, 2)
    up_b = params["up_b"]                                    # (Cup,)
    w_mat = jnp.transpose(up_w, (0, 2, 3, 1)).reshape(cin, 4 * cup)
    b_vec = jnp.tile(up_b, 4)
    y = matmul_bias(x1.reshape(n * h * w, cin), w_mat, b_vec)    # (NHW, 4*Cup) bf16
    # TODO(synk): write the (di,dj) interleave directly from the kernel out_spec;
    # it is now only a bf16 (not f32) XLA round trip.
    y = (y.reshape(n, h, w, 2, 2, cup)
          .transpose(0, 1, 3, 2, 4, 5)
          .reshape(n, 2 * h, 2 * w, cup))

    # --- F.pad(x1, [0, diffX % 2, 0, diffY % 2], mode='replicate') ---
    diff_y = x2.shape[1] - y.shape[1]
    diff_x = x2.shape[2] - y.shape[2]
    y = jnp.pad(y, ((0, 0), (0, diff_y % 2), (0, diff_x % 2), (0, 0)), mode="edge")

    # --- torch.cat([x2, x1], dim=1) (channel concat -> NHWC axis=-1) ---
    x = jnp.concatenate([x2, y], axis=-1)

    # --- DoubleConv: (conv3x3 replicate, bias=False -> BN -> ReLU) * 2 ---
    x = conv3x3_bn_relu(x, params["conv1_w"], params["bn1_g"], params["bn1_b"])
    x = conv3x3_bn_relu(x, params["conv2_w"], params["bn2_g"], params["bn2_b"])

    return jnp.transpose(x, (0, 3, 1, 2)).astype(jnp.float32)       # back to NCHW


# ------------------------------ parameters -----------------------------------

def init_params(key, in_channels, out_channels):
    cup = in_channels // 2
    ks = jax.random.split(key, 7)

    def rnd(k, shape, scale=0.1):
        return scale * jax.random.normal(k, shape, dtype=jnp.float32)

    return {
        "up_w": rnd(ks[0], (in_channels, cup, 2, 2)),          # ConvTranspose2d.weight
        "up_b": rnd(ks[1], (cup,)),                            # ConvTranspose2d.bias
        "conv1_w": rnd(ks[2], (out_channels, in_channels, 3, 3)),
        "bn1_g": 1.0 + rnd(ks[3], (out_channels,)),
        "bn1_b": rnd(ks[4], (out_channels,)),
        "conv2_w": rnd(ks[5], (out_channels, out_channels, 3, 3)),
        "bn2_g": 1.0 + rnd(ks[6], (out_channels,)),
        "bn2_b": jnp.zeros((out_channels,), jnp.float32),
    }


# --------------------------------- main ---------------------------------------

if __name__ == "__main__":
    key = jax.random.PRNGKey(0)
    k1, k2, kparam = jax.random.split(key, 3)

    in_channels, out_channels = 8, 4
    # x1: low-res / high-channel feature map (NCHW), x2: skip connection (NCHW)
    x1 = jax.random.normal(k1, (2, in_channels, 8, 8), dtype=jnp.float32)
    x2 = jax.random.normal(k2, (2, in_channels // 2, 16, 16), dtype=jnp.float32)

    params = init_params(kparam, in_channels, out_channels)

    fwd = jax.jit(functools.partial(up_forward, params=params))
    out = jax.block_until_ready(fwd(x1, x2))

    assert out.shape == (2, out_channels, 16, 16), out.shape
    assert bool(jnp.all(jnp.isfinite(out)))
    print("KERNEL_OK")
</pallas_src>

<mosaic_0001>
module attributes {stable_mosaic.version = 11 : i64} {
  func.func @_matmul_bias_kernel(%arg0: i32, %arg1: memref<128x128xbf16, #tpu.memory_space<vmem>>, %arg2: memref<128x128xbf16, #tpu.memory_space<vmem>>, %arg3: memref<1x128xf32, #tpu.memory_space<vmem>>, %arg4: memref<128x128xbf16, #tpu.memory_space<vmem>>) attributes {dimension_semantics = [#tpu.dimension_semantics<parallel>], iteration_bounds = array<i64: 1>, scalar_prefetch = 0 : i64, scratch_operands = 0 : i64, tpu.core_type = #tpu.core_type<tc>, window_params = [{transform_indices = @transform_0, window_bounds = array<i64: 128, 128>}, {pipeline_mode = #tpu.pipeline_mode<synchronous>, transform_indices = @transform_1, window_bounds = array<i64: 128, 128>}, {pipeline_mode = #tpu.pipeline_mode<synchronous>, transform_indices = @transform_2, window_bounds = array<i64: 1, 128>}, {transform_indices = @transform_3, window_bounds = array<i64: 128, 128>}]} {
    %c0 = arith.constant 0 : index
    %c0_0 = arith.constant 0 : index
    %0 = vector.load %arg1[%c0, %c0_0] : memref<128x128xbf16, #tpu.memory_space<vmem>>, vector<128x128xbf16>
    %c0_1 = arith.constant 0 : index
    %c0_2 = arith.constant 0 : index
    %1 = vector.load %arg2[%c0_1, %c0_2] : memref<128x128xbf16, #tpu.memory_space<vmem>>, vector<128x128xbf16>
    %cst = arith.constant dense<0.000000e+00> : vector<128x128xf32>
    %2 = tpu.matmul %0, %1, %cst {dimension_numbers = #tpu.dot_dimension_numbers<[1], [0], [0], [1], [0, 0, 1, 1], [], []>} : vector<128x128xbf16>, vector<128x128xbf16>, vector<128x128xf32> -> vector<128x128xf32>
    %c0_3 = arith.constant 0 : index
    %c0_4 = arith.constant 0 : index
    %3 = vector.load %arg3[%c0_3, %c0_4] : memref<1x128xf32, #tpu.memory_space<vmem>>, vector<1x128xf32>
    %4 = vector.broadcast %3 : vector<1x128xf32> to vector<128x128xf32>
    %5 = arith.addf %2, %4 : vector<128x128xf32>
    %6 = arith.truncf %5 : vector<128x128xf32> to vector<128x128xbf16>
    %c0_5 = arith.constant 0 : index
    %c0_6 = arith.constant 0 : index
    %7 = vector.load %arg4[%c0_5, %c0_6] : memref<128x128xbf16, #tpu.memory_space<vmem>>, vector<128x128xbf16>
    tpu.vector_store %arg4[%c0_5, %c0_6], %6 {strides = array<i32>} : memref<128x128xbf16, #tpu.memory_space<vmem>>, vector<128x128xbf16>,
    return
  }
  func.func @transform_0(%arg0: i32) -> (i32, i32) {
    %c0_i32 = arith.constant 0 : i32
    %c0_i32_0 = arith.constant 0 : i32
    return %arg0, %c0_i32 : i32, i32
  }
  func.func @transform_1(%arg0: i32) -> (i32, i32) {
    %c0_i32 = arith.constant 0 : i32
    %c0_i32_0 = arith.constant 0 : i32
    %c0_i32_1 = arith.constant 0 : i32
    return %c0_i32, %c0_i32_0 : i32, i32
  }
  func.func @transform_2(%arg0: i32) -> (i32, i32) {
    %c0_i32 = arith.constant 0 : i32
    %c0_i32_0 = arith.constant 0 : i32
    %c0_i32_1 = arith.constant 0 : i32
    return %c0_i32, %c0_i32_0 : i32, i32
  }
  func.func @transform_3(%arg0: i32) -> (i32, i32) {
    %c0_i32 = arith.constant 0 : i32
    %c0_i32_0 = arith.constant 0 : i32
    return %arg0, %c0_i32 : i32, i32
  }
}

module attributes {stable_mosaic.version = 11 : i64} {
  func.func @_conv_matmul_stats_kernel(%arg0: i32, %arg1: i32, %arg2: memref<256x128xbf16, #tpu.memory_space<vmem>>, %arg3: memref<128x128xbf16, #tpu.memory_space<vmem>>, %arg4: memref<256x128xbf16, #tpu.memory_space<vmem>>, %arg5: memref<8x128xf32, #tpu.memory_space<vmem>>, %arg6: memref<8x128xf32, #tpu.memory_space<vmem>>) attributes {dimension_semantics = [#tpu.dimension_semantics<parallel>, #tpu.dimension_semantics<arbitrary>], iteration_bounds = array<i64: 2, 1>, scalar_prefetch = 0 : i64, scratch_operands = 0 : i64, tpu.core_type = #tpu.core_type<tc>, window_params = [{transform_indices = @transform_0, window_bounds = array<i64: 256, 128>}, {pipeline_mode = #tpu.pipeline_mode<synchronous>, transform_indices = @transform_1, window_bounds = array<i64: 128, 128>}, {transform_indices = @transform_2, window_bounds = array<i64: 256, 128>}, {transform_indices = @transform_3, window_bounds = array<i64: 8, 128>}, {transform_indices = @transform_4, window_bounds = array<i64: 8, 128>}]} {
    %c0_i32 = arith.constant 0 : i32
    %0 = arith.cmpi eq, %arg1, %c0_i32 : i32
    %1 = arith.extui %0 : i1 to i32
    %c0_i32_0 = arith.constant 0 : i32
    %2 = arith.cmpi ne, %1, %c0_i32_0 : i32
    scf.if %2 {
      %cst_16 = arith.constant 0.000000e+00 : f32
      %18 = vector.broadcast %cst_16 : f32 to vector<8x128xf32>
      %c0_17 = arith.constant 0 : index
      %c0_18 = arith.constant 0 : index
      %19 = vector.load %arg5[%c0_17, %c0_18] : memref<8x128xf32, #tpu.memory_space<vmem>>, vector<8x128xf32>
      tpu.vector_store %arg5[%c0_17, %c0_18], %18 {strides = array<i32>} : memref<8x128xf32, #tpu.memory_space<vmem>>, vector<8x128xf32>,
      %cst_19 = arith.constant 0.000000e+00 : f32
      %20 = vector.broadcast %cst_19 : f32 to vector<8x128xf32>
      %c0_20 = arith.constant 0 : index
      %c0_21 = arith.constant 0 : index
      %21 = vector.load %arg6[%c0_20, %c0_21] : memref<8x128xf32, #tpu.memory_space<vmem>>, vector<8x128xf32>
      tpu.vector_store %arg6[%c0_20, %c0_21], %20 {strides = array<i32>} : memref<8x128xf32, #tpu.memory_space<vmem>>, vector<8x128xf32>,
    } else {
    }
    %c0 = arith.constant 0 : index
    %c0_1 = arith.constant 0 : index
    %3 = vector.load %arg2[%c0, %c0_1] : memref<256x128xbf16, #tpu.memory_space<vmem>>, vector<256x128xbf16>
    %c0_2 = arith.constant 0 : index
    %c0_3 = arith.constant 0 : index
    %4 = vector.load %arg3[%c0_2, %c0_3] : memref<128x128xbf16, #tpu.memory_space<vmem>>, vector<128x128xbf16>
    %cst = arith.constant dense<0.000000e+00> : vector<256x128xf32>
    %5 = tpu.matmul %3, %4, %cst {dimension_numbers = #tpu.dot_dimension_numbers<[1], [0], [0], [1], [0, 0, 1, 1], [], []>} : vector<256x128xbf16>, vector<128x128xbf16>, vector<256x128xf32> -> vector<256x128xf32>
    %6 = arith.truncf %5 : vector<256x128xf32> to vector<256x128xbf16>
    %c0_4 = arith.constant 0 : index
    %c0_5 = arith.constant 0 : index
    %7 = vector.load %arg4[%c0_4, %c0_5] : memref<256x128xbf16, #tpu.memory_space<vmem>>, vector<256x128xbf16>
    tpu.vector_store %arg4[%c0_4, %c0_5], %6 {strides = array<i32>} : memref<256x128xbf16, #tpu.memory_space<vmem>>, vector<256x128xbf16>,
    %8 = vector.shape_cast %5 : vector<256x128xf32> to vector<32x8x128xf32>
    %c0_6 = arith.constant 0 : index
    %c0_7 = arith.constant 0 : index
    %9 = vector.load %arg5[%c0_6, %c0_7] : memref<8x128xf32, #tpu.memory_space<vmem>>, vector<8x128xf32>
    %cst_8 = arith.constant dense<0.000000e+00> : vector<8x128xf32>
    %10 = vector.multi_reduction <add>, %8, %cst_8 [0] : vector<32x8x128xf32> to vector<8x128xf32>
    %11 = arith.addf %9, %10 : vector<8x128xf32>
    %c0_9 = arith.constant 0 : index
    %c0_10 = arith.constant 0 : index
    %12 = vector.load %arg5[%c0_9, %c0_10] : memref<8x128xf32, #tpu.memory_space<vmem>>, vector<8x128xf32>
    tpu.vector_store %arg5[%c0_9, %c0_10], %11 {strides = array<i32>} : memref<8x128xf32, #tpu.memory_space<vmem>>, vector<8x128xf32>,
    %c0_11 = arith.constant 0 : index
    %c0_12 = arith.constant 0 : index
    %13 = vector.load %arg6[%c0_11, %c0_12] : memref<8x128xf32, #tpu.memory_space<vmem>>, vector<8x128xf32>
    %14 = arith.mulf %8, %8 : vector<32x8x128xf32>
    %cst_13 = arith.constant dense<0.000000e+00> : vector<8x128xf32>
    %15 = vector.multi_reduction <add>, %14, %cst_13 [0] : vector<32x8x128xf32> to vector<8x128xf32>
    %16 = arith.addf %13, %15 : vector<8x128xf32>
    %c0_14 = arith.constant 0 : index
    %c0_15 = arith.constant 0 : index
    %17 = vector.load %arg6[%c0_14, %c0_15] : memref<8x128xf32, #tpu.memory_space<vmem>>, vector<8x128xf32>
    tpu.vector_store %arg6[%c0_14, %c0_15], %16 {strides = array<i32>} : memref<8x128xf32, #tpu.memory_space<vmem>>, vector<8x128xf32>,
    return
  }
  func.func @transform_0(%arg0: i32, %arg1: i32) -> (i32, i32) {
    %c1_i32 = arith.constant 1 : i32
    %0 = arith.muli %arg0, %c1_i32 : i32
    %1 = arith.addi %0, %arg1 : i32
    %c0_i32 = arith.constant 0 : i32
    %c0_i32_0 = arith.constant 0 : i32
    return %1, %c0_i32 : i32, i32
  }
  func.func @transform_1(%arg0: i32, %arg1: i32) -> (i32, i32) {
    %c0_i32 = arith.constant 0 : i32
    %c0_i32_0 = arith.constant 0 : i32
    %c0_i32_1 = arith.constant 0 : i32
    return %c0_i32, %c0_i32_0 : i32, i32
  }
  func.func @transform_2(%arg0: i32, %arg1: i32) -> (i32, i32) {
    %c1_i32 = arith.constant 1 : i32
    %0 = arith.muli %arg0, %c1_i32 : i32
    %1 = arith.addi %0, %arg1 : i32
    %c0_i32 = arith.constant 0 : i32
    %c0_i32_0 = arith.constant 0 : i32
    return %1, %c0_i32 : i32, i32
  }
  func.func @transform_3(%arg0: i32, %arg1: i32) -> (i32, i32) {
    %c0_i32 = arith.constant 0 : i32
    %c0_i32_0 = arith.constant 0 : i32
    return %arg0, %c0_i32 : i32, i32
  }
  func.func @transform_4(%arg0: i32, %arg1: i32) -> (i32, i32) {
    %c0_i32 = arith.constant 0 : i32
    %c0_i32_0 = arith.constant 0 : i32
    return %arg0, %c0_i32 : i32, i32
  }
}

module attributes {stable_mosaic.version = 11 : i64} {
  func.func @_scale_shift_relu_kernel(%arg0: i32, %arg1: memref<512x128xbf16, #tpu.memory_space<vmem>>, %arg2: memref<1x128xf32, #tpu.memory_space<vmem>>, %arg3: memref<1x128xf32, #tpu.memory_space<vmem>>, %arg4: memref<512x128xbf16, #tpu.memory_space<vmem>>) attributes {dimension_semantics = [#tpu.dimension_semantics<parallel>], iteration_bounds = array<i64: 1>, scalar_prefetch = 0 : i64, scratch_operands = 0 : i64, tpu.core_type = #tpu.core_type<tc>, window_params = [{transform_indices = @transform_0, window_bounds = array<i64: 512, 128>}, {pipeline_mode = #tpu.pipeline_mode<synchronous>, transform_indices = @transform_1, window_bounds = array<i64: 1, 128>}, {pipeline_mode = #tpu.pipeline_mode<synchronous>, transform_indices = @transform_2, window_bounds = array<i64: 1, 128>}, {transform_indices = @transform_3, window_bounds = array<i64: 512, 128>}]} {
    %c0 = arith.constant 0 : index
    %c0_0 = arith.constant 0 : index
    %0 = vector.load %arg1[%c0, %c0_0] : memref<512x128xbf16, #tpu.memory_space<vmem>>, vector<512x128xbf16>
    %1 = arith.extf %0 : vector<512x128xbf16> to vector<512x128xf32>
    %c0_1 = arith.constant 0 : index
    %c0_2 = arith.constant 0 : index
    %2 = vector.load %arg2[%c0_1, %c0_2] : memref<1x128xf32, #tpu.memory_space<vmem>>, vector<1x128xf32>
    %3 = vector.broadcast %2 : vector<1x128xf32> to vector<512x128xf32>
    %4 = arith.mulf %1, %3 : vector<512x128xf32>
    %c0_3 = arith.constant 0 : index
    %c0_4 = arith.constant 0 : index
    %5 = vector.load %arg3[%c0_3, %c0_4] : memref<1x128xf32, #tpu.memory_space<vmem>>, vector<1x128xf32>
    %6 = vector.broadcast %5 : vector<1x128xf32> to vector<512x128xf32>
    %7 = arith.addf %4, %6 : vector<512x128xf32>
    %cst = arith.constant 0.000000e+00 : f32
    %8 = vector.broadcast %cst : f32 to vector<512x128xf32>
    %9 = arith.maximumf %7, %8 : vector<512x128xf32>
    %10 = arith.truncf %9 : vector<512x128xf32> to vector<512x128xbf16>
    %c0_5 = arith.constant 0 : index
    %c0_6 = arith.constant 0 : index
    %11 = vector.load %arg4[%c0_5, %c0_6] : memref<512x128xbf16, #tpu.memory_space<vmem>>, vector<512x128xbf16>
    tpu.vector_store %arg4[%c0_5, %c0_6], %10 {strides = array<i32>} : memref<512x128xbf16, #tpu.memory_space<vmem>>, vector<512x128xbf16>,
    return
  }
  func.func @transform_0(%arg0: i32) -> (i32, i32) {
    %c0_i32 = arith.constant 0 : i32
    %c0_i32_0 = arith.constant 0 : i32
    return %arg0, %c0_i32 : i32, i32
  }
  func.func @transform_1(%arg0: i32) -> (i32, i32) {
    %c0_i32 = arith.constant 0 : i32
    %c0_i32_0 = arith.constant 0 : i32
    %c0_i32_1 = arith.constant 0 : i32
    return %c0_i32, %c0_i32_0 : i32, i32
  }
  func.func @transform_2(%arg0: i32) -> (i32, i32) {
    %c0_i32 = arith.constant 0 : i32
    %c0_i32_0 = arith.constant 0 : i32
    %c0_i32_1 = arith.constant 0 : i32
    return %c0_i32, %c0_i32_0 : i32, i32
  }
  func.func @transform_3(%arg0: i32) -> (i32, i32) {
    %c0_i32 = arith.constant 0 : i32
    %c0_i32_0 = arith.constant 0 : i32
    return %arg0, %c0_i32 : i32, i32
  }
}

</mosaic_0001>

<bundles_post_ra>
// kernel: tile.6
= control target key start
LH: loop header
LB: loop body
LE: loop exit
PB: predicated region body
PF: predicated region fallthrough
CT: control target
= control target key end

     0   :  { %s22_s0 = inlined_call_operand.vmem [shape: f32[4], index: 0, kind: input, shape index: {}]   ;;  %s23_s1 = inlined_call_operand.vmem [shape: f32[4,4], index: 1, kind: output, shape index: {}]  }
   0x1   :  { %v4_v0 = vld [vmem:[%s22_s0] ss:$0 sm:$0xff] }
   0x2   :  { %5 = vst [vmem:[%s23_s1] sm:$0xf] %v4_v0 }

// kernel: tile.7
= control target key start
LH: loop header
LB: loop body
LE: loop exit
PB: predicated region body
PF: predicated region fallthrough
CT: control target
= control target key end

     0   :  { %s37_s8 = smov 4   ;;  %s38_s9 = smov 8   ;;  %vm7_vm0 = vcmask 31744   ;;  %vm13_vm1 = vcmask 130144   ;;  %vm19_vm2 = vcmask 97344   ;;  %vm25_vm3 = vcmask 64544   ;;  %s55_s0 = inlined_call_operand.vmem [shape: f32[4,4], index: 0, kind: input, shape index: {}]   ;;  %s56_s1 = inlined_call_operand.vmem [shape: f32[1,16], index: 1, kind: output, shape index: {}]  }
   0x1   :  { %v4_v0 = vld [vmem:[%s55_s0] sm:$0xf]  ;;  %s36_s0 = smov 12  }
   0x2   :  { %5 = vst [vmem:[#allocation1] sm:$0xf] %v4_v0 }
   0x9   :  { %v10_v1 = vld [vmem:[#allocation1 + $0x3] sm:$0x1]   ;;  %v22_v2 = vld [vmem:[#allocation1 + $0x1] sm:$0x1]   ;;  %v16_v3 = vld [vmem:[#allocation1 + $0x2] sm:$0x1]  }
   0xa   :  { %11 = vrot.lane.b32.xlu0 %v10_v1, %s36_s0  ;;  %23 = vrot.lane.b32.xlu1 %v22_v2, %s37_s8  ;;  %v6_v4 = vld [vmem:[#allocation1] sm:$0x1]  }
   0xb   :  { %8 = vst.msk [vmem:[#allocation0] sm:$0x1] %vm7_vm0, %v6_v4  }
  0x12   :  { %17 = vrot.lane.b32.xlu0 %v16_v3, %s38_s9 }
  0x7c   :  { %v12_v5 = vpop.permute.xlu0 %11   ;;  %v24_v6 = vpop.permute.xlu1 %23  }
  0x7d   :  { %14 = vst.msk [vmem:[#allocation0] sm:$0x1] %vm13_vm1, %v12_v5  }
  0x84   :  { %v18_v7 = vpop.permute.xlu0 %17  }
  0x85   :  { %20 = vst.msk [vmem:[#allocation0] sm:$0x1] %vm19_vm2, %v18_v7  }
  0x86   :  { %26 = vst.msk [vmem:[#allocation0] sm:$0x1] %vm25_vm3, %v24_v6  }
  0x8d   :  { %v29_v8 = vld [vmem:[#allocation0] sm:$0x1] }
  0x8e   :  { %32 = vst [vmem:[%s56_s1] sm:$0x1] %v29_v8 }

// kernel: up_forward.5
= control target key start
LH: loop header
LB: loop body
LE: loop exit
PB: predicated region body
PF: predicated region fallthrough
CT: control target
= control target key end

     0   :  { %s478_s1 = inlined_call_operand.vmem [shape: bf16[128,128], index: 1, kind: input, shape index: {}]   ;;  %s479_s2 = inlined_call_operand.vmem [shape: f32[1,128], index: 2, kind: input, shape index: {}]   ;;  %s480_s0 = inlined_call_operand.vmem [shape: bf16[128,128], index: 0, kind: input, shape index: {}]   ;;  %s481_s3 = inlined_call_operand.vmem [shape: bf16[128,128], index: 3, kind: output, shape index: {}]  }
   0x1   :  { %v310_v0 = vld [vmem:[%s478_s1 + $0x38] sm:$0xff]  ;;  %v309_v1 = vld [vmem:[%s478_s1 + $0x30] sm:$0xff]  ;;  %v308_v2 = vld [vmem:[%s478_s1 + $0x28] sm:$0xff] }
   0x2   :  { %146 = vmatpush.bf16.msra.mxu0 %v310_v0  ;;  %358 = vmatpush.bf16.msra.mxu1 %v310_v0  ;;  %v307_v3 = vld [vmem:[%s478_s1 + $0x20] sm:$0xff]  ;;  %v306_v4 = vld [vmem:[%s478_s1 + $0x18] sm:$0xff]  ;;  %v305_v5 = vld [vmem:[%s478_s1 + $0x10] sm:$0xff] }
   0x3   :  { %359 = vmatpush.bf16.msra.mxu2 %v310_v0  ;;  %360 = vmatpush.bf16.msra.mxu3 %v310_v0  ;;  %v304_v6 = vld [vmem:[%s478_s1 + $0x8] sm:$0xff]  ;;  %v303_v7 = vld [vmem:[%s478_s1] sm:$0xff]  ;;  %v297_v9 = vld [vmem:[%s480_s0 + $0x10] sm:$0xff] }
   0x4   :  { %v295_v8 = vld [vmem:[%s480_s0] sm:$0xff]  ;;  %v301_v11 = vld [vmem:[%s480_s0 + $0x30] sm:$0xff]  ;;  %v296_v12 = vld [vmem:[%s480_s0 + $0x8] sm:$0xff] }
   0x5   :  { %v299_v10 = vld [vmem:[%s480_s0 + $0x20] sm:$0xff]  ;;  %v298_v13 = vld [vmem:[%s480_s0 + $0x18] sm:$0xff]  ;;  %v300_v14 = vld [vmem:[%s480_s0 + $0x28] sm:$0xff] }
   0x6   :  { %147 = vmatpush.bf16.msra.mxu0 %v309_v1  ;;  %361 = vmatpush.bf16.msra.mxu1 %v309_v1  ;;  %v302_v15 = vld [vmem:[%s480_s0 + $0x38] sm:$0xff]  ;;  %v382_v18 = vld [vmem:[%s479_s2] ss:$0 sm:$0xff] }
   0x7   :  { %362 = vmatpush.bf16.msra.mxu2 %v309_v1  ;;  %363 = vmatpush.bf16.msra.mxu3 %v309_v1 }
   0xa   :  { %148 = vmatpush.bf16.msra.mxu0 %v308_v2  ;;  %364 = vmatpush.bf16.msra.mxu1 %v308_v2 }
   0xb   :  { %365 = vmatpush.bf16.msra.mxu2 %v308_v2  ;;  %366 = vmatpush.bf16.msra.mxu3 %v308_v2 }
   0xe   :  { %149 = vmatpush.bf16.msra.mxu0 %v307_v3  ;;  %367 = vmatpush.bf16.msra.mxu1 %v307_v3 }
   0xf   :  { %368 = vmatpush.bf16.msra.mxu2 %v307_v3  ;;  %369 = vmatpush.bf16.msra.mxu3 %v307_v3 }
  0x12   :  { %150 = vmatpush.bf16.msra.mxu0 %v306_v4  ;;  %370 = vmatpush.bf16.msra.mxu1 %v306_v4 }
  0x13   :  { %371 = vmatpush.bf16.msra.mxu2 %v306_v4  ;;  %372 = vmatpush.bf16.msra.mxu3 %v306_v4 }
  0x16   :  { %151 = vmatpush.bf16.msra.mxu0 %v305_v5  ;;  %373 = vmatpush.bf16.msra.mxu1 %v305_v5 }
  0x17   :  { %374 = vmatpush.bf16.msra.mxu2 %v305_v5  ;;  %375 = vmatpush.bf16.msra.mxu3 %v305_v5 }
  0x1a   :  { %152 = vmatpush.bf16.msra.mxu0 %v304_v6  ;;  %376 = vmatpush.bf16.msra.mxu1 %v304_v6 }
  0x1b   :  { %377 = vmatpush.bf16.msra.mxu2 %v304_v6  ;;  %378 = vmatpush.bf16.msra.mxu3 %v304_v6 }
  0x1e   :  { %153 = vmatpush.bf16.msra.mxu0 %v303_v7  ;;  %379 = vmatpush.bf16.msra.mxu1 %v303_v7 }
  0x1f   :  { %380 = vmatpush.bf16.msra.mxu2 %v303_v7  ;;  %381 = vmatpush.bf16.msra.mxu3 %v303_v7 }
  0x21   :  { %154 = vmatmul.bf16.vlgmr.msra.gmra.mxu0 %v295_v8  ;;  %164 = vmatmul.bf16.vlgmr.msra.gmra.mxu1 %v297_v9 }
  0x22   :  { %174 = vmatmul.bf16.vlgmr.msra.gmra.mxu2 %v299_v10  ;;  %184 = vmatmul.bf16.vlgmr.msra.gmra.mxu3 %v301_v11 }
  0x31   :  { %159 = vmatmul.bf16.gmra.mxu0 %v296_v12  ;;  %169 = vmatmul.bf16.gmra.mxu1 %v298_v13 }
  0x32   :  { %179 = vmatmul.bf16.gmra.mxu2 %v300_v14  ;;  %189 = vmatmul.bf16.gmra.mxu3 %v302_v15 }
  0x9e   :  { %v155_v16 = vpop.f32.mrf.mxu0  ;;  %v165_v17 = vpop.f32.mrf.mxu1 }
  0x9f   :  { %v156_v23 = vadd.f32 %v382_v18, %v155_v16  ;;  %v166_v24 = vadd.f32 %v382_v18, %v165_v17 }
  0xa5   :  { %v175_v19 = vpop.f32.mrf.mxu2  ;;  %v185_v20 = vpop.f32.mrf.mxu3 }
  0xa6   :  { %v157_v21 = vpop.f32.mrf.mxu0  ;;  %v167_v22 = vpop.f32.mrf.mxu1  ;;  %v176_v31 = vadd.f32 %v382_v18, %v175_v19  ;;  %v186_v32 = vadd.f32 %v382_v18, %v185_v20 }
  0xa7   :  { %v158_v25 = vadd.f32 %v382_v18, %v157_v21  ;;  %v168_v26 = vadd.f32 %v382_v18, %v167_v22 }
  0xa9   :  { %v314_v27 = vpack.c.bf16 %v158_v25, %v156_v23  ;;  %v324_v28 = vpack.c.bf16 %v168_v26, %v166_v24 }
  0xab   :  { %315 = vst [vmem:[%s481_s3] sm:$0xff] %v314_v27  }
  0xac   :  { %352 = vst [vmem:[%s481_s3 + $0x10] sm:$0xff] %v324_v28  }
  0xad   :  { %v177_v29 = vpop.f32.mrf.mxu2  ;;  %v187_v30 = vpop.f32.mrf.mxu3 }
  0xae   :  { %v178_v33 = vadd.f32 %v382_v18, %v177_v29  ;;  %v188_v34 = vadd.f32 %v382_v18, %v187_v30  ;;  %v160_v35 = vpop.f32.mrf.mxu0  ;;  %v170_v36 = vpop.f32.mrf.mxu1 }
  0xaf   :  { %v161_v43 = vadd.f32 %v382_v18, %v160_v35  ;;  %v171_v44 = vadd.f32 %v382_v18, %v170_v36 }
  0xb0   :  { %v334_v37 = vpack.c.bf16 %v178_v33, %v176_v31  ;;  %v344_v38 = vpack.c.bf16 %v188_v34, %v186_v32 }
  0xb2   :  { %354 = vst [vmem:[%s481_s3 + $0x20] sm:$0xff] %v334_v37  }
  0xb3   :  { %356 = vst [vmem:[%s481_s3 + $0x30] sm:$0xff] %v344_v38  }
  0xb5   :  { %v180_v39 = vpop.f32.mrf.mxu2  ;;  %v190_v40 = vpop.f32.mrf.mxu3 }
  0xb6   :  { %v162_v41 = vpop.f32.mrf.mxu0  ;;  %v172_v42 = vpop.f32.mrf.mxu1  ;;  %v181_v51 = vadd.f32 %v382_v18, %v180_v39  ;;  %v191_v52 = vadd.f32 %v382_v18, %v190_v40 }
  0xb7   :  { %v163_v45 = vadd.f32 %v382_v18, %v162_v41  ;;  %v173_v46 = vadd.f32 %v382_v18, %v172_v42 }
  0xb9   :  { %v319_v47 = vpack.c.bf16 %v163_v45, %v161_v43  ;;  %v329_v48 = vpack.c.bf16 %v173_v46, %v171_v44 }
  0xbb   :  { %351 = vst [vmem:[%s481_s3 + $0x8] sm:$0xff] %v319_v47  }
  0xbc   :  { %353 = vst [vmem:[%s481_s3 + $0x18] sm:$0xff] %v329_v48  }
  0xbd   :  { %v182_v49 = vpop.f32.mrf.mxu2  ;;  %v192_v50 = vpop.f32.mrf.mxu3 }
  0xbe   :  { %v183_v53 = vadd.f32 %v382_v18, %v182_v49  ;;  %v193_v54 = vadd.f32 %v382_v18, %v192_v50 }
  0xc0   :  { %v339_v55 = vpack.c.bf16 %v183_v53, %v181_v51  ;;  %v349_v56 = vpack.c.bf16 %v193_v54, %v191_v52 }
  0xc2   :  { %355 = vst [vmem:[%s481_s3 + $0x28] sm:$0xff] %v339_v55  }
  0xc3   :  { %357 = vst [vmem:[%s481_s3 + $0x38] sm:$0xff] %v349_v56  }

// kernel: up_forward.6
= control target key start
LH: loop header
LB: loop body
LE: loop exit
PB: predicated region body
PF: predicated region fallthrough
CT: control target
= control target key end

     0   :  { %s1153_s15 = smov 0   ;;  %s1155_s16 = smov 0   ;;  %s1384_s0 = inlined_call_operand.vmem [shape: bf16[512,128], index: 0, kind: input, shape index: {}]   ;;  %s1385_s1 = inlined_call_operand.vmem [shape: bf16[128,128], index: 1, kind: input, shape index: {}]   ;;  %s1386_s2 = inlined_call_operand.vmem [shape: bf16[512,128], index: 2, kind: output, shape index: {0}]   ;;  %s1387_s3 = inlined_call_operand.vmem [shape: f32[16,128], index: 3, kind: output, shape index: {1}]   ;;  %s1388_s4 = inlined_call_operand.vmem [shape: f32[16,128], index: 4, kind: output, shape index: {2}]  }
   0x1   :  { %s1157_s17 = smov 0  }
   0x2 LB: > { %s27_s18 = sadd.s32 1, %s1122_s16  ;;  %p831_p0 = scmp.ge.s32.totalorder %s1126_s17, 1  ;;  %s1126_s17 = sphi %s1157_s17, %s15_s17   ;;  %s1122_s16 = sphi %s1155_s16, %s1390_s16   ;;  %s1118_s15 = sphi %s1153_s15, %s1389_s15  }
   0x3   : > { %p29_p1 = scmp.ge.s32.totalorder %s27_s18, 2  ;;  %p186_p2 = scmp.lt.s32.totalorder %s1126_s17, 3 }
   0x5   : > { %s1392_s18 = smov (%p29_p1, %s27_s18), 0  ;;  %p187_p3 = pnand %p831_p0, %p186_p2 }
   0x6   : > { %s832_s27 = sshll.u32 (!%p187_p3), %s1118_s15, 5  ;;  %p238_p5 = scmp.lt.s32.totalorder (!%p187_p3), %s1118_s15, 1 }
   0x7   : > { %190 = sbr.rel (%p187_p3) target bundleno = 279 (0x117), region = 28  ;;  %p224_p4 = scmp.lt.s32.totalorder (!%p187_p3), %s832_s27, 63 }
   0xc   : > { %v959_v0 = vld [vmem:[%s1385_s1 + $0x38] sm:$0xff]  ;;  %v958_v1 = vld [vmem:[%s1385_s1 + $0x30] sm:$0xff]  ;;  %v957_v2 = vld [vmem:[%s1385_s1 + $0x28] sm:$0xff]  ;;  %s1394_s27 = smov (!%p224_p4, %s832_s27), 63  ;;  %s1396_s15 = smov (!%p238_p5, %s1118_s15), 1 }
   0xd   : > { %444 = vmatpush.bf16.msra.mxu0 %v959_v0  ;;  %1055 = vmatpush.bf16.msra.mxu1 %v959_v0  ;;  %v956_v3 = vld [vmem:[%s1385_s1 + $0x20] sm:$0xff]  ;;  %v955_v4 = vld [vmem:[%s1385_s1 + $0x18] sm:$0xff]  ;;  %v954_v5 = vld [vmem:[%s1385_s1 + $0x10] sm:$0xff]  ;;  %s833_s8 = sshll.u32 %s1394_s27, 2  ;;  %s836_s21 = sshll.u32 %s1396_s15, 3 }
   0xe   : > { %1056 = vmatpush.bf16.msra.mxu2 %v959_v0  ;;  %1057 = vmatpush.bf16.msra.mxu3 %v959_v0  ;;  %v953_v6 = vld [vmem:[%s1385_s1 + $0x8] sm:$0xff]  ;;  %v952_v7 = vld [vmem:[%s1385_s1] sm:$0xff]  ;;  %s1206_s13 = scalar_lea.vmem %s1384_s0, %s833_s8  ;;  %s1233_s20 = scalar_lea.vmem %s1386_s2, %s833_s8 }
   0xf   : > { %v936_v8 = vld [vmem:[%s1206_s13] sm:$0xff]  ;;  %v937_v12 = vld [vmem:[%s1206_s13 + $0x8] sm:$0xff]  ;;  %v938_v16 = vld [vmem:[%s1206_s13 + $0x10] sm:$0xff]  ;;  %s241_s24 = scalar_lea.vmem %s1387_s3, %s836_s21  ;;  %s245_s27 = scalar_lea.vmem %s1388_s4, %s836_s21 }
  0x10   : > { %v940_v9 = vld [vmem:[%s1206_s13 + $0x20] sm:$0xff]  ;;  %v941_v13 = vld [vmem:[%s1206_s13 + $0x28] sm:$0xff]  ;;  %v942_v17 = vld [vmem:[%s1206_s13 + $0x30] sm:$0xff] }
  0x11   : > { %445 = vmatpush.bf16.msra.mxu0 %v958_v1  ;;  %1058 = vmatpush.bf16.msra.mxu1 %v958_v1  ;;  %v944_v10 = vld [vmem:[%s1206_s13 + $0x40] sm:$0xff]  ;;  %v945_v14 = vld [vmem:[%s1206_s13 + $0x48] sm:$0xff]  ;;  %v946_v18 = vld [vmem:[%s1206_s13 + $0x50] sm:$0xff] }
  0x12   : > { %1059 = vmatpush.bf16.msra.mxu2 %v958_v1  ;;  %1060 = vmatpush.bf16.msra.mxu3 %v958_v1  ;;  %v948_v11 = vld [vmem:[%s1206_s13 + $0x60] sm:$0xff]  ;;  %v949_v15 = vld [vmem:[%s1206_s13 + $0x68] sm:$0xff]  ;;  %v950_v19 = vld [vmem:[%s1206_s13 + $0x70] sm:$0xff] }
  0x13   : > { %v939_v20 = vld [vmem:[%s1206_s13 + $0x18] sm:$0xff] }
  0x14   : > { %v943_v21 = vld [vmem:[%s1206_s13 + $0x38] sm:$0xff] }
  0x15   : > { %446 = vmatpush.bf16.msra.mxu0 %v957_v2  ;;  %1061 = vmatpush.bf16.msra.mxu1 %v957_v2  ;;  %v947_v22 = vld [vmem:[%s1206_s13 + $0x58] sm:$0xff] }
  0x16   : > { %1062 = vmatpush.bf16.msra.mxu2 %v957_v2  ;;  %1063 = vmatpush.bf16.msra.mxu3 %v957_v2  ;;  %v951_v23 = vld [vmem:[%s1206_s13 + $0x78] sm:$0xff] }
  0x19   : > { %447 = vmatpush.bf16.msra.mxu0 %v956_v3  ;;  %1064 = vmatpush.bf16.msra.mxu1 %v956_v3 }
  0x1a   : > { %1065 = vmatpush.bf16.msra.mxu2 %v956_v3  ;;  %1066 = vmatpush.bf16.msra.mxu3 %v956_v3 }
  0x1d   : > { %448 = vmatpush.bf16.msra.mxu0 %v955_v4  ;;  %1067 = vmatpush.bf16.msra.mxu1 %v955_v4 }
  0x1e   : > { %1068 = vmatpush.bf16.msra.mxu2 %v955_v4  ;;  %1069 = vmatpush.bf16.msra.mxu3 %v955_v4 }
  0x21   : > { %449 = vmatpush.bf16.msra.mxu0 %v954_v5  ;;  %1070 = vmatpush.bf16.msra.mxu1 %v954_v5 }
  0x22   : > { %1071 = vmatpush.bf16.msra.mxu2 %v954_v5  ;;  %1072 = vmatpush.bf16.msra.mxu3 %v954_v5 }
  0x25   : > { %450 = vmatpush.bf16.msra.mxu0 %v953_v6  ;;  %1073 = vmatpush.bf16.msra.mxu1 %v953_v6 }
  0x26   : > { %1074 = vmatpush.bf16.msra.mxu2 %v953_v6  ;;  %1075 = vmatpush.bf16.msra.mxu3 %v953_v6 }
  0x29   : > { %451 = vmatpush.bf16.msra.mxu0 %v952_v7  ;;  %1076 = vmatpush.bf16.msra.mxu1 %v952_v7 }
  0x2a   : > { %1077 = vmatpush.bf16.msra.mxu2 %v952_v7  ;;  %1078 = vmatpush.bf16.msra.mxu3 %v952_v7 }
  0x2c   : > { %452 = vmatmul.bf16.vlgmr.msra.gmra.mxu0 %v936_v8  ;;  %472 = vmatmul.bf16.vlgmr.msra.gmra.mxu1 %v940_v9 }
  0x2d   : > { %492 = vmatmul.bf16.vlgmr.msra.gmra.mxu2 %v944_v10  ;;  %512 = vmatmul.bf16.vlgmr.msra.gmra.mxu3 %v948_v11 }
  0x3c   : > { %457 = vmatmul.bf16.gmra.mxu0 %v937_v12  ;;  %477 = vmatmul.bf16.gmra.mxu1 %v941_v13 }
  0x3d   : > { %497 = vmatmul.bf16.gmra.mxu2 %v945_v14  ;;  %517 = vmatmul.bf16.gmra.mxu3 %v949_v15 }
  0x4c   : > { %462 = vmatmul.bf16.gmra.mxu0 %v938_v16  ;;  %482 = vmatmul.bf16.gmra.mxu1 %v942_v17 }
  0x4d   : > { %502 = vmatmul.bf16.gmra.mxu2 %v946_v18  ;;  %522 = vmatmul.bf16.gmra.mxu3 %v950_v19 }
  0x5c   : > { %467 = vmatmul.bf16.gmra.mxu0 %v939_v20  ;;  %487 = vmatmul.bf16.gmra.mxu1 %v943_v21 }
  0x5d   : > { %507 = vmatmul.bf16.gmra.mxu2 %v947_v22  ;;  %527 = vmatmul.bf16.gmra.mxu3 %v951_v23 }
  0xa9   : > { %v453_v24 = vpop.f32.mrf.mxu0  ;;  %v1224_v25 = vpop.f32.mrf.mxu1 }
  0xaa   : > { %v632_v57 = vmul.f32 %v453_v24, %v453_v24 }
  0xb0   : > { %v1226_v26 = vpop.f32.mrf.mxu2  ;;  %v1239_v31 = vpop.f32.mrf.mxu3 }
  0xb1   : > { %v455_v27 = vpop.f32.mrf.mxu0  ;;  %v1235_v28 = vpop.f32.mrf.mxu1 }
  0xb2   : > { %v963_v29 = vpack.c.bf16 %v455_v27, %v453_v24  ;;  %v983_v30 = vpack.c.bf16 %v1235_v28, %v1224_v25  ;;  %v633_v56 = vmul.f32 %v455_v27, %v455_v27  ;;  %v598_v59 = vadd.f32 %v455_v27, %v453_v24 }
  0xb3   : > { %v640_v27 = vmul.f32 %v1224_v25, %v1224_v25 }
  0xb4   : > { %964 = vst [vmem:[%s1233_s20] sm:$0xff] %v963_v29   ;;  %v664_v60 = vadd.f32 %v633_v56, %v632_v57 }
  0xb5   : > { %1043 = vst [vmem:[%s1233_s20 + $0x20] sm:$0xff] %v983_v30  }
  0xb8   : > { %v1243_v32 = vpop.f32.mrf.mxu2  ;;  %v1249_v36 = vpop.f32.mrf.mxu3 }
  0xb9   : > { %v458_v33 = vpop.f32.mrf.mxu0  ;;  %v1245_v34 = vpop.f32.mrf.mxu1  ;;  %v1003_v35 = vpack.c.bf16 %v1243_v32, %v1226_v26  ;;  %v1023_v37 = vpack.c.bf16 %v1249_v36, %v1239_v31 }
  0xba   : > { %v634_v58 = vmul.f32 %v458_v33, %v458_v33  ;;  %v599_v62 = vadd.f32 %v598_v59, %v458_v33 }
  0xbb   : > { %1047 = vst [vmem:[%s1233_s20 + $0x40] sm:$0xff] %v1003_v35  }
  0xbc   : > { %1051 = vst [vmem:[%s1233_s20 + $0x60] sm:$0xff] %v1023_v37   ;;  %v665_v0 = vadd.f32 %v664_v60, %v634_v58 }
  0xc0   : > { %v1255_v38 = vpop.f32.mrf.mxu2  ;;  %v1261_v43 = vpop.f32.mrf.mxu3 }
  0xc1   : > { %v460_v39 = vpop.f32.mrf.mxu0  ;;  %v1257_v40 = vpop.f32.mrf.mxu1 }
  0xc2   : > { %v968_v41 = vpack.c.bf16 %v460_v39, %v458_v33  ;;  %v988_v42 = vpack.c.bf16 %v1257_v40, %v1245_v34  ;;  %v635_v61 = vmul.f32 %v460_v39, %v460_v39  ;;  %v600_v5 = vadd.f32 %v599_v62, %v460_v39 }
  0xc3   : > { %v641_v33 = vmul.f32 %v1235_v28, %v1235_v28  ;;  %v642_v39 = vmul.f32 %v1245_v34, %v1245_v34 }
  0xc4   : > { %1040 = vst [vmem:[%s1233_s20 + $0x8] sm:$0xff] %v968_v41   ;;  %v666_v7 = vadd.f32 %v665_v0, %v635_v61 }
  0xc5   : > { %1044 = vst [vmem:[%s1233_s20 + $0x28] sm:$0xff] %v988_v42  }
  0xc8   : > { %v1265_v44 = vpop.f32.mrf.mxu2  ;;  %v1271_v48 = vpop.f32.mrf.mxu3 }
  0xc9   : > { %v463_v45 = vpop.f32.mrf.mxu0  ;;  %v1267_v46 = vpop.f32.mrf.mxu1  ;;  %v1008_v47 = vpack.c.bf16 %v1265_v44, %v1255_v38  ;;  %v1028_v49 = vpack.c.bf16 %v1271_v48, %v1261_v43 }
  0xca   : > { %v636_v1 = vmul.f32 %v463_v45, %v463_v45  ;;  %v601_v10 = vadd.f32 %v600_v5, %v463_v45  ;;  %v649_v5 = vmul.f32 %v1243_v32, %v1243_v32 }
  0xcb   : > { %1048 = vst [vmem:[%s1233_s20 + $0x48] sm:$0xff] %v1008_v47  }
  0xcc   : > { %1052 = vst [vmem:[%s1233_s20 + $0x68] sm:$0xff] %v1028_v49   ;;  %v667_v11 = vadd.f32 %v666_v7, %v636_v1 }
  0xd0   : > { %v1277_v50 = vpop.f32.mrf.mxu2  ;;  %v1283_v55 = vpop.f32.mrf.mxu3 }
  0xd1   : > { %v465_v51 = vpop.f32.mrf.mxu0  ;;  %v1279_v52 = vpop.f32.mrf.mxu1 }
  0xd2   : > { %v973_v53 = vpack.c.bf16 %v465_v51, %v463_v45  ;;  %v993_v54 = vpack.c.bf16 %v1279_v52, %v1267_v46  ;;  %v637_v8 = vmul.f32 %v465_v51, %v465_v51  ;;  %v602_v13 = vadd.f32 %v601_v10, %v465_v51 }
  0xd3   : > { %v645_v57 = vmul.f32 %v1279_v52, %v1279_v52  ;;  %v651_v10 = vmul.f32 %v1265_v44, %v1265_v44 }
  0xd4   : > { %1041 = vst [vmem:[%s1233_s20 + $0x10] sm:$0xff] %v973_v53   ;;  %v668_v14 = vadd.f32 %v667_v11, %v637_v8 }
  0xd5   : > { %1045 = vst [vmem:[%s1233_s20 + $0x30] sm:$0xff] %v993_v54   ;;  %v644_v54 = vmul.f32 %v1267_v46, %v1267_v46 }
  0xd8   : > { %v1287_v63 = vpop.f32.mrf.mxu2  ;;  %v1291_v6 = vpop.f32.mrf.mxu3 }
  0xd9   : > { %v468_v2 = vpop.f32.mrf.mxu0  ;;  %v488_v3 = vpop.f32.mrf.mxu1  ;;  %v1013_v4 = vpack.c.bf16 %v1287_v63, %v1277_v50  ;;  %v1033_v9 = vpack.c.bf16 %v1291_v6, %v1283_v55 }
  0xda   : > { %v638_v12 = vmul.f32 %v468_v2, %v468_v2  ;;  %v603_v15 = vadd.f32 %v602_v13, %v468_v2  ;;  %v646_v60 = vmul.f32 %v488_v3, %v488_v3 }
  0xdb   : > { %1049 = vst [vmem:[%s1233_s20 + $0x50] sm:$0xff] %v1013_v4  }
  0xdc   : > { %1053 = vst [vmem:[%s1233_s20 + $0x70] sm:$0xff] %v1033_v9   ;;  %v669_v17 = vadd.f32 %v668_v14, %v638_v12 }
  0xe0   : > { %v508_v16 = vpop.f32.mrf.mxu2  ;;  %v1297_v24 = vpop.f32.mrf.mxu3 }
  0xe1   : > { %v470_v18 = vpop.f32.mrf.mxu0  ;;  %v490_v19 = vpop.f32.mrf.mxu1 }
  0xe2   : > { %v978_v20 = vpack.c.bf16 %v470_v18, %v468_v2  ;;  %v604_v21 = vadd.f32 %v603_v15, %v470_v18  ;;  %v639_v22 = vmul.f32 %v470_v18, %v470_v18  ;;  %v998_v23 = vpack.c.bf16 %v490_v19, %v488_v3 }
  0xe3   : > { %v647_v1 = vmul.f32 %v490_v19, %v490_v19  ;;  %v648_v2 = vmul.f32 %v1226_v26, %v1226_v26  ;;  %v653_v15 = vmul.f32 %v1287_v63, %v1287_v63 }
  0xe4   : > { %1042 = vst [vmem:[%s1233_s20 + $0x18] sm:$0xff] %v978_v20   ;;  %v605_v29 = vadd.f32 %v604_v21, %v1224_v25  ;;  %v670_v30 = vadd.f32 %v669_v17, %v639_v22  ;;  %v643_v25 = vmul.f32 %v1257_v40, %v1257_v40 }
  0xe5   : > { %1046 = vst [vmem:[%s1233_s20 + $0x38] sm:$0xff] %v998_v23  }
  0xe6   : > { %v606_v35 = vadd.f32 %v605_v29, %v1235_v28  ;;  %v671_v37 = vadd.f32 %v670_v30, %v640_v27  ;;  %v657_v27 = vmul.f32 %v1249_v36, %v1249_v36  ;;  %v658_v30 = vmul.f32 %v1261_v43, %v1261_v43 }
  0xe8   : > { %v607_v41 = vadd.f32 %v606_v35, %v1245_v34  ;;  %v672_v42 = vadd.f32 %v671_v37, %v641_v33  ;;  %v510_v45 = vpop.f32.mrf.mxu2  ;;  %v1313_v53 = vpop.f32.mrf.mxu3  ;;  %v659_v35 = vmul.f32 %v1271_v48, %v1271_v48 }
  0xe9   : > { %v1018_v47 = vpack.c.bf16 %v510_v45, %v508_v16  ;;  %v1038_v28 = vpack.c.bf16 %v1313_v53, %v1297_v24  ;;  %v655_v22 = vmul.f32 %v510_v45, %v510_v45 }
  0xea   : > { %v673_v49 = vadd.f32 %v672_v42, %v642_v39  ;;  %v608_v51 = vadd.f32 %v607_v41, %v1257_v40  ;;  %v660_v39 = vmul.f32 %v1283_v55, %v1283_v55 }
  0xeb   : > { %1050 = vst [vmem:[%s1233_s20 + $0x58] sm:$0xff] %v1018_v47  }
  0xec   : > { %v609_v34 = vadd.f32 %v608_v51, %v1267_v46  ;;  %v674_v56 = vadd.f32 %v673_v49, %v643_v25  ;;  %1054 = vst [vmem:[%s1233_s20 + $0x78] sm:$0xff] %v1038_v28   ;;  %v662_v49 = vmul.f32 %v1297_v24, %v1297_v24 }
  0xee   : > { %v610_v58 = vadd.f32 %v609_v34, %v1279_v52  ;;  %v675_v59 = vadd.f32 %v674_v56, %v644_v54  ;;  %v650_v52 = vmul.f32 %v1255_v38, %v1255_v38 }
  0xf0   : > { %v611_v40 = vadd.f32 %v610_v58, %v488_v3  ;;  %v676_v61 = vadd.f32 %v675_v59, %v645_v57 }
  0xf2   : > { %v677_v62 = vadd.f32 %v676_v61, %v646_v60  ;;  %v612_v0 = vadd.f32 %v611_v40, %v490_v19  ;;  %v654_v19 = vmul.f32 %v508_v16, %v508_v16 }
  0xf4   : > { %v613_v4 = vadd.f32 %v612_v0, %v1226_v26  ;;  %v678_v46 = vadd.f32 %v677_v62, %v647_v1  ;;  %v652_v26 = vmul.f32 %v1277_v50, %v1277_v50 }
  0xf6   : > { %v614_v7 = vadd.f32 %v613_v4, %v1243_v32  ;;  %v679_v8 = vadd.f32 %v678_v46, %v648_v2 }
  0xf8   : > { %v615_v3 = vadd.f32 %v614_v7, %v1255_v38  ;;  %v680_v9 = vadd.f32 %v679_v8, %v649_v5 }
  0xfa   : > { %v681_v11 = vadd.f32 %v680_v9, %v650_v52  ;;  %v616_v12 = vadd.f32 %v615_v3, %v1265_v44  ;;  %v656_v44 = vmul.f32 %v1239_v31, %v1239_v31 }
  0xfc   : > { %v617_v13 = vadd.f32 %v616_v12, %v1277_v50  ;;  %v682_v14 = vadd.f32 %v681_v11, %v651_v10 }
  0xfe   : > { %v618_v32 = vadd.f32 %v617_v13, %v1287_v63  ;;  %v683_v17 = vadd.f32 %v682_v14, %v652_v26 }
 0x100   : > { %v684_v38 = vadd.f32 %v683_v17, %v653_v15  ;;  %v619_v18 = vadd.f32 %v618_v32, %v508_v16 }
 0x102   : > { %v685_v20 = vadd.f32 %v684_v38, %v654_v19  ;;  %v620_v21 = vadd.f32 %v619_v18, %v510_v45 }
 0x104   : > { %v621_v50 = vadd.f32 %v620_v21, %v1239_v31  ;;  %v686_v23 = vadd.f32 %v685_v20, %v655_v22 }
 0x106   : > { %v622_v63 = vadd.f32 %v621_v50, %v1249_v36  ;;  %v687_v29 = vadd.f32 %v686_v23, %v656_v44 }
 0x108   : > { %v623_v16 = vadd.f32 %v622_v63, %v1261_v43  ;;  %v688_v33 = vadd.f32 %v687_v29, %v657_v27  ;;  %v661_v43 = vmul.f32 %v1291_v6, %v1291_v6 }
 0x10a   : > { %v689_v37 = vadd.f32 %v688_v33, %v658_v30  ;;  %v624_v31 = vadd.f32 %v623_v16, %v1271_v48 }
 0x10c   : > { %v625_v41 = vadd.f32 %v624_v31, %v1283_v55  ;;  %v690_v36 = vadd.f32 %v689_v37, %v659_v35  ;;  %v663_v55 = vmul.f32 %v1313_v53, %v1313_v53 }
 0x10e   : > { %v626_v42 = vadd.f32 %v625_v41, %v1291_v6  ;;  %v691_v45 = vadd.f32 %v690_v36, %v660_v39 }
 0x110   : > { %v692_v47 = vadd.f32 %v691_v45, %v661_v43  ;;  %v627_v25 = vadd.f32 %v626_v42, %v1297_v24 }
 0x112   : > { %v693_v48 = vadd.f32 %v692_v47, %v662_v49  ;;  %v628_v51 = vadd.f32 %v627_v25, %v1313_v53 }
 0x114   : > { %v694_v28 = vadd.f32 %v693_v48, %v663_v55  ;;  %630 = vst [vmem:[%s241_s24] sm:$0xff] %v628_v51 }
 0x116   : > { %696 = vst [vmem:[%s245_s27] sm:$0xff] %v694_v28 }
 0x117 PF: > { %s15_s17 = sadd.s32 1, %s1126_s17   ;;  %s1389_s15 = smov %s1122_s16 }
 0x118   : > { %p12_p6 = scmp.ge.s32.totalorder %s15_s17, 4   ;;  %s1390_s16 = smov %s1392_s18 }
 0x11a   :  { %14 = sbr.rel (!%p12_p6) target bundleno = 2 (0x2), region = 86 }

// kernel: up_forward.7
= control target key start
LH: loop header
LB: loop body
LE: loop exit
PB: predicated region body
PF: predicated region fallthrough
CT: control target
= control target key end

     0   :  { %s1176_s0 = inlined_call_operand.vmem [shape: bf16[512,128], index: 0, kind: input, shape index: {}]   ;;  %s1177_s1 = inlined_call_operand.vmem [shape: f32[1,128], index: 1, kind: input, shape index: {}]   ;;  %s1178_s2 = inlined_call_operand.vmem [shape: f32[1,128], index: 2, kind: input, shape index: {}]   ;;  %s1179_s3 = inlined_call_operand.vmem [shape: bf16[512,128], index: 3, kind: output, shape index: {}]  }
   0x1   :  { %v475_v0 = vld [vmem:[%s1176_s0] sm:$0xff]   ;;  %v762_v5 = vld [vmem:[%s1176_s0 + $0x8] sm:$0xff]   ;;  %v763_v8 = vld [vmem:[%s1176_s0 + $0x10] sm:$0xff]  }
   0x2   :  { %v852_v1 = vld [vmem:[%s1177_s1] ss:$0 sm:$0xff]  ;;  %v476_v2 = vunpack.c.l.bf16 %v475_v0  ;;  %v477_v3 = vunpack.c.h.bf16 %v475_v0  ;;  %v480_v6 = vunpack.c.l.bf16 %v762_v5  ;;  %v481_v7 = vunpack.c.h.bf16 %v762_v5  ;;  %v764_v9 = vld [vmem:[%s1176_s0 + $0x18] sm:$0xff]   ;;  %v766_v35 = vld [vmem:[%s1176_s0 + $0x28] sm:$0xff]  }
   0x3   :  { %v857_v4 = vld [vmem:[%s1178_s2] ss:$0 sm:$0xff]  ;;  %v484_v12 = vunpack.c.l.bf16 %v763_v8  ;;  %v485_v13 = vunpack.c.h.bf16 %v763_v8  ;;  %v488_v16 = vunpack.c.l.bf16 %v764_v9  ;;  %v489_v17 = vunpack.c.h.bf16 %v764_v9  ;;  %v767_v40 = vld [vmem:[%s1176_s0 + $0x30] sm:$0xff]   ;;  %v768_v45 = vld [vmem:[%s1176_s0 + $0x38] sm:$0xff]  }
   0x4   :  { %v146_v10 = vmul.f32 %v852_v1, %v476_v2  ;;  %v147_v11 = vmul.f32 %v852_v1, %v477_v3  ;;  %v148_v14 = vmul.f32 %v852_v1, %v480_v6  ;;  %v149_v15 = vmul.f32 %v852_v1, %v481_v7  ;;  %v765_v26 = vld [vmem:[%s1176_s0 + $0x20] sm:$0xff]  }
   0x5   :  { %v150_v20 = vmul.f32 %v852_v1, %v484_v12  ;;  %v151_v21 = vmul.f32 %v852_v1, %v485_v13  ;;  %v152_v24 = vmul.f32 %v852_v1, %v488_v16  ;;  %v153_v25 = vmul.f32 %v852_v1, %v489_v17  ;;  %v769_v62 = vld [vmem:[%s1176_s0 + $0x40] sm:$0xff]   ;;  %v770_v13 = vld [vmem:[%s1176_s0 + $0x48] sm:$0xff]  }
   0x6   :  { %v214_v18 = vadd.f32 %v857_v4, %v146_v10  ;;  %v215_v19 = vadd.f32 %v857_v4, %v147_v11  ;;  %v216_v22 = vadd.f32 %v857_v4, %v148_v14  ;;  %v217_v23 = vadd.f32 %v857_v4, %v149_v15 }
   0x7   :  { %v218_v29 = vadd.f32 %v857_v4, %v150_v20  ;;  %v219_v30 = vadd.f32 %v857_v4, %v151_v21  ;;  %v220_v33 = vadd.f32 %v857_v4, %v152_v24  ;;  %v221_v34 = vadd.f32 %v857_v4, %v153_v25 }
   0x8   :  { %v278_v27 = vmax.f32 %v214_v18, 0.0  ;;  %v279_v28 = vmax.f32 %v215_v19, 0.0  ;;  %v280_v31 = vmax.f32 %v216_v22, 0.0  ;;  %v281_v32 = vmax.f32 %v217_v23, 0.0  ;;  %v771_v18 = vld [vmem:[%s1176_s0 + $0x50] sm:$0xff]   ;;  %v772_v23 = vld [vmem:[%s1176_s0 + $0x58] sm:$0xff]  }
   0x9   :  { %v282_v37 = vmax.f32 %v218_v29, 0.0  ;;  %v283_v38 = vmax.f32 %v219_v30, 0.0  ;;  %v492_v39 = vunpack.c.l.bf16 %v765_v26  ;;  %v284_v42 = vmax.f32 %v220_v33, 0.0 }
   0xa   :  { %v605_v36 = vpack.c.bf16 %v279_v28, %v278_v27  ;;  %v610_v41 = vpack.c.bf16 %v281_v32, %v280_v31  ;;  %v285_v43 = vmax.f32 %v221_v34, 0.0  ;;  %v493_v44 = vunpack.c.h.bf16 %v765_v26 }
   0xb   :  { %v615_v46 = vpack.c.bf16 %v283_v38, %v282_v37  ;;  %v154_v47 = vmul.f32 %v852_v1, %v492_v39  ;;  %v496_v48 = vunpack.c.l.bf16 %v766_v35  ;;  %v497_v49 = vunpack.c.h.bf16 %v766_v35 }
   0xc   :  { %606 = vst [vmem:[%s1179_s3] sm:$0xff] %v605_v36   ;;  %v620_v50 = vpack.c.bf16 %v285_v43, %v284_v42  ;;  %v155_v51 = vmul.f32 %v852_v1, %v493_v44  ;;  %v500_v52 = vunpack.c.l.bf16 %v767_v40  ;;  %v501_v53 = vunpack.c.h.bf16 %v767_v40  ;;  %v773_v36 = vld [vmem:[%s1176_s0 + $0x60] sm:$0xff]  }
   0xd   :  { %793 = vst [vmem:[%s1179_s3 + $0x8] sm:$0xff] %v610_v41   ;;  %v222_v54 = vadd.f32 %v857_v4, %v154_v47  ;;  %v156_v55 = vmul.f32 %v852_v1, %v496_v48  ;;  %v157_v56 = vmul.f32 %v852_v1, %v497_v49  ;;  %v504_v57 = vunpack.c.l.bf16 %v768_v45 }
   0xe   :  { %794 = vst [vmem:[%s1179_s3 + $0x10] sm:$0xff] %v615_v46   ;;  %v223_v58 = vadd.f32 %v857_v4, %v155_v51  ;;  %v158_v59 = vmul.f32 %v852_v1, %v500_v52  ;;  %v159_v60 = vmul.f32 %v852_v1, %v501_v53  ;;  %v505_v61 = vunpack.c.h.bf16 %v768_v45  ;;  %v774_v53 = vld [vmem:[%s1176_s0 + $0x68] sm:$0xff]  }
   0xf   :  { %795 = vst [vmem:[%s1179_s3 + $0x18] sm:$0xff] %v620_v50   ;;  %v286_v63 = vmax.f32 %v222_v54, 0.0  ;;  %v224_v0 = vadd.f32 %v857_v4, %v156_v55  ;;  %v225_v2 = vadd.f32 %v857_v4, %v157_v56  ;;  %v160_v3 = vmul.f32 %v852_v1, %v504_v57 }
  0x10   :  { %v287_v5 = vmax.f32 %v223_v58, 0.0  ;;  %v226_v6 = vadd.f32 %v857_v4, %v158_v59  ;;  %v227_v7 = vadd.f32 %v857_v4, %v159_v60  ;;  %v161_v8 = vmul.f32 %v852_v1, %v505_v61  ;;  %v775_v58 = vld [vmem:[%s1176_s0 + $0x70] sm:$0xff]  }
  0x11   :  { %v288_v9 = vmax.f32 %v224_v0, 0.0  ;;  %v289_v10 = vmax.f32 %v225_v2, 0.0  ;;  %v228_v11 = vadd.f32 %v857_v4, %v160_v3  ;;  %v508_v12 = vunpack.c.l.bf16 %v769_v62 }
  0x12   :  { %v625_v14 = vpack.c.bf16 %v287_v5, %v286_v63  ;;  %v290_v15 = vmax.f32 %v226_v6, 0.0  ;;  %v291_v16 = vmax.f32 %v227_v7, 0.0  ;;  %v229_v17 = vadd.f32 %v857_v4, %v161_v8  ;;  %v776_v63 = vld [vmem:[%s1176_s0 + $0x78] sm:$0xff]  }
  0x13   :  { %v630_v19 = vpack.c.bf16 %v289_v10, %v288_v9  ;;  %v292_v20 = vmax.f32 %v228_v11, 0.0  ;;  %v509_v21 = vunpack.c.h.bf16 %v769_v62  ;;  %v162_v22 = vmul.f32 %v852_v1, %v508_v12 }
  0x14   :  { %796 = vst [vmem:[%s1179_s3 + $0x20] sm:$0xff] %v625_v14   ;;  %v635_v24 = vpack.c.bf16 %v291_v16, %v290_v15  ;;  %v293_v25 = vmax.f32 %v229_v17, 0.0  ;;  %v512_v26 = vunpack.c.l.bf16 %v770_v13  ;;  %v513_v27 = vunpack.c.h.bf16 %v770_v13  ;;  %v777_v14 = vld [vmem:[%s1176_s0 + $0x80] sm:$0xff]  }
  0x15   :  { %797 = vst [vmem:[%s1179_s3 + $0x28] sm:$0xff] %v630_v19   ;;  %v163_v28 = vmul.f32 %v852_v1, %v509_v21  ;;  %v230_v29 = vadd.f32 %v857_v4, %v162_v22  ;;  %v516_v30 = vunpack.c.l.bf16 %v771_v18  ;;  %v517_v31 = vunpack.c.h.bf16 %v771_v18 }
  0x16   :  { %798 = vst [vmem:[%s1179_s3 + $0x30] sm:$0xff] %v635_v24   ;;  %v640_v32 = vpack.c.bf16 %v293_v25, %v292_v20  ;;  %v164_v33 = vmul.f32 %v852_v1, %v512_v26  ;;  %v165_v34 = vmul.f32 %v852_v1, %v513_v27  ;;  %v520_v35 = vunpack.c.l.bf16 %v772_v23  ;;  %v778_v27 = vld [vmem:[%s1176_s0 + $0x88] sm:$0xff]  }
  0x17   :  { %v231_v37 = vadd.f32 %v857_v4, %v163_v28  ;;  %v294_v38 = vmax.f32 %v230_v29, 0.0  ;;  %v166_v39 = vmul.f32 %v852_v1, %v516_v30  ;;  %v167_v40 = vmul.f32 %v852_v1, %v517_v31 }
  0x18   :  { %799 = vst [vmem:[%s1179_s3 + $0x38] sm:$0xff] %v640_v32   ;;  %v232_v41 = vadd.f32 %v857_v4, %v164_v33  ;;  %v233_v42 = vadd.f32 %v857_v4, %v165_v34  ;;  %v521_v43 = vunpack.c.h.bf16 %v772_v23  ;;  %v168_v44 = vmul.f32 %v852_v1, %v520_v35 }
  0x19   :  { %v295_v45 = vmax.f32 %v231_v37, 0.0  ;;  %v234_v46 = vadd.f32 %v857_v4, %v166_v39  ;;  %v235_v47 = vadd.f32 %v857_v4, %v167_v40  ;;  %v524_v48 = vunpack.c.l.bf16 %v773_v36 }
  0x1a   :  { %v296_v49 = vmax.f32 %v232_v41, 0.0  ;;  %v297_v50 = vmax.f32 %v233_v42, 0.0  ;;  %v169_v51 = vmul.f32 %v852_v1, %v521_v43  ;;  %v236_v52 = vadd.f32 %v857_v4, %v168_v44  ;;  %v780_v41 = vld [vmem:[%s1176_s0 + $0x98] sm:$0xff]  }
  0x1b   :  { %v645_v54 = vpack.c.bf16 %v295_v45, %v294_v38  ;;  %v298_v55 = vmax.f32 %v234_v46, 0.0  ;;  %v299_v56 = vmax.f32 %v235_v47, 0.0  ;;  %v525_v57 = vunpack.c.h.bf16 %v773_v36  ;;  %v779_v36 = vld [vmem:[%s1176_s0 + $0x90] sm:$0xff]  }
  0x1c   :  { %v650_v59 = vpack.c.bf16 %v297_v50, %v296_v49  ;;  %v237_v60 = vadd.f32 %v857_v4, %v169_v51  ;;  %v300_v61 = vmax.f32 %v236_v52, 0.0  ;;  %v170_v62 = vmul.f32 %v852_v1, %v524_v48 }
  0x1d   :  { %800 = vst [vmem:[%s1179_s3 + $0x40] sm:$0xff] %v645_v54   ;;  %v655_v0 = vpack.c.bf16 %v299_v56, %v298_v55  ;;  %v171_v2 = vmul.f32 %v852_v1, %v525_v57  ;;  %v528_v3 = vunpack.c.l.bf16 %v774_v53  ;;  %v529_v5 = vunpack.c.h.bf16 %v774_v53  ;;  %v781_v54 = vld [vmem:[%s1176_s0 + $0xa0] sm:$0xff]  }
  0x1e   :  { %801 = vst [vmem:[%s1179_s3 + $0x48] sm:$0xff] %v650_v59   ;;  %v301_v6 = vmax.f32 %v237_v60, 0.0  ;;  %v238_v7 = vadd.f32 %v857_v4, %v170_v62  ;;  %v532_v8 = vunpack.c.l.bf16 %v775_v58  ;;  %v533_v9 = vunpack.c.h.bf16 %v775_v58 }
  0x1f   :  { %802 = vst [vmem:[%s1179_s3 + $0x50] sm:$0xff] %v655_v0   ;;  %v239_v10 = vadd.f32 %v857_v4, %v171_v2  ;;  %v172_v11 = vmul.f32 %v852_v1, %v528_v3  ;;  %v173_v12 = vmul.f32 %v852_v1, %v529_v5  ;;  %v536_v13 = vunpack.c.l.bf16 %v776_v63  ;;  %v782_v5 = vld [vmem:[%s1176_s0 + $0xa8] sm:$0xff]  }
  0x20   :  { %v660_v15 = vpack.c.bf16 %v301_v6, %v300_v61  ;;  %v302_v16 = vmax.f32 %v238_v7, 0.0  ;;  %v174_v17 = vmul.f32 %v852_v1, %v532_v8  ;;  %v175_v18 = vmul.f32 %v852_v1, %v533_v9 }
  0x21   :  { %v303_v19 = vmax.f32 %v239_v10, 0.0  ;;  %v240_v20 = vadd.f32 %v857_v4, %v172_v11  ;;  %v241_v21 = vadd.f32 %v857_v4, %v173_v12  ;;  %v537_v22 = vunpack.c.h.bf16 %v776_v63 }
  0x22   :  { %803 = vst [vmem:[%s1179_s3 + $0x58] sm:$0xff] %v660_v15   ;;  %v242_v23 = vadd.f32 %v857_v4, %v174_v17  ;;  %v243_v24 = vadd.f32 %v857_v4, %v175_v18  ;;  %v176_v25 = vmul.f32 %v852_v1, %v536_v13  ;;  %v540_v26 = vunpack.c.l.bf16 %v777_v14 }
  0x23   :  { %v665_v28 = vpack.c.bf16 %v303_v19, %v302_v16  ;;  %v304_v29 = vmax.f32 %v240_v20, 0.0  ;;  %v305_v30 = vmax.f32 %v241_v21, 0.0  ;;  %v177_v31 = vmul.f32 %v852_v1, %v537_v22 }
  0x24   :  { %v306_v32 = vmax.f32 %v242_v23, 0.0  ;;  %v307_v33 = vmax.f32 %v243_v24, 0.0  ;;  %v244_v34 = vadd.f32 %v857_v4, %v176_v25  ;;  %v541_v35 = vunpack.c.h.bf16 %v777_v14  ;;  %v783_v14 = vld [vmem:[%s1176_s0 + $0xb0] sm:$0xff]   ;;  %v784_v23 = vld [vmem:[%s1176_s0 + $0xb8] sm:$0xff]  }
  0x25   :  { %804 = vst [vmem:[%s1179_s3 + $0x60] sm:$0xff] %v665_v28   ;;  %v670_v37 = vpack.c.bf16 %v305_v30, %v304_v29  ;;  %v245_v38 = vadd.f32 %v857_v4, %v177_v31  ;;  %v178_v39 = vmul.f32 %v852_v1, %v540_v26  ;;  %v544_v40 = vunpack.c.l.bf16 %v778_v27 }
  0x26   :  { %v675_v42 = vpack.c.bf16 %v307_v33, %v306_v32  ;;  %v308_v43 = vmax.f32 %v244_v34, 0.0  ;;  %v179_v44 = vmul.f32 %v852_v1, %v541_v35  ;;  %v545_v45 = vunpack.c.h.bf16 %v778_v27  ;;  %v785_v32 = vld [vmem:[%s1176_s0 + $0xc0] sm:$0xff]  }
  0x27   :  { %805 = vst [vmem:[%s1179_s3 + $0x68] sm:$0xff] %v670_v37   ;;  %v309_v46 = vmax.f32 %v245_v38, 0.0  ;;  %v246_v47 = vadd.f32 %v857_v4, %v178_v39  ;;  %v180_v48 = vmul.f32 %v852_v1, %v544_v40  ;;  %v548_v49 = vunpack.c.l.bf16 %v779_v36 }
  0x28   :  { %806 = vst [vmem:[%s1179_s3 + $0x70] sm:$0xff] %v675_v42   ;;  %v247_v50 = vadd.f32 %v857_v4, %v179_v44  ;;  %v181_v51 = vmul.f32 %v852_v1, %v545_v45  ;;  %v549_v52 = vunpack.c.h.bf16 %v779_v36  ;;  %v552_v53 = vunpack.c.l.bf16 %v780_v41  ;;  %v786_v45 = vld [vmem:[%s1176_s0 + $0xc8] sm:$0xff]  }
  0x29   :  { %v680_v55 = vpack.c.bf16 %v309_v46, %v308_v43  ;;  %v310_v56 = vmax.f32 %v246_v47, 0.0  ;;  %v248_v57 = vadd.f32 %v857_v4, %v180_v48  ;;  %v182_v58 = vmul.f32 %v852_v1, %v548_v49 }
  0x2a   :  { %v311_v59 = vmax.f32 %v247_v50, 0.0  ;;  %v249_v60 = vadd.f32 %v857_v4, %v181_v51  ;;  %v183_v61 = vmul.f32 %v852_v1, %v549_v52  ;;  %v553_v62 = vunpack.c.h.bf16 %v780_v41 }
  0x2b   :  { %807 = vst [vmem:[%s1179_s3 + $0x78] sm:$0xff] %v680_v55   ;;  %v312_v63 = vmax.f32 %v248_v57, 0.0  ;;  %v250_v0 = vadd.f32 %v857_v4, %v182_v58  ;;  %v184_v2 = vmul.f32 %v852_v1, %v552_v53  ;;  %v556_v3 = vunpack.c.l.bf16 %v781_v54 }
  0x2c   :  { %v685_v6 = vpack.c.bf16 %v311_v59, %v310_v56  ;;  %v313_v7 = vmax.f32 %v249_v60, 0.0  ;;  %v251_v8 = vadd.f32 %v857_v4, %v183_v61  ;;  %v185_v9 = vmul.f32 %v852_v1, %v553_v62 }
  0x2d   :  { %v314_v10 = vmax.f32 %v250_v0, 0.0  ;;  %v252_v11 = vadd.f32 %v857_v4, %v184_v2  ;;  %v557_v12 = vunpack.c.h.bf16 %v781_v54  ;;  %v186_v13 = vmul.f32 %v852_v1, %v556_v3  ;;  %v787_v54 = vld [vmem:[%s1176_s0 + $0xd0] sm:$0xff]  }
  0x2e   :  { %808 = vst [vmem:[%s1179_s3 + $0x80] sm:$0xff] %v685_v6   ;;  %v690_v15 = vpack.c.bf16 %v313_v7, %v312_v63  ;;  %v315_v16 = vmax.f32 %v251_v8, 0.0  ;;  %v253_v17 = vadd.f32 %v857_v4, %v185_v9  ;;  %v560_v18 = vunpack.c.l.bf16 %v782_v5  ;;  %v788_v63 = vld [vmem:[%s1176_s0 + $0xd8] sm:$0xff]  }
  0x2f   :  { %v316_v19 = vmax.f32 %v252_v11, 0.0  ;;  %v187_v20 = vmul.f32 %v852_v1, %v557_v12  ;;  %v254_v21 = vadd.f32 %v857_v4, %v186_v13  ;;  %v561_v22 = vunpack.c.h.bf16 %v782_v5 }
  0x30   :  { %809 = vst [vmem:[%s1179_s3 + $0x88] sm:$0xff] %v690_v15   ;;  %v695_v24 = vpack.c.bf16 %v315_v16, %v314_v10  ;;  %v317_v25 = vmax.f32 %v253_v17, 0.0  ;;  %v188_v26 = vmul.f32 %v852_v1, %v560_v18  ;;  %v564_v27 = vunpack.c.l.bf16 %v783_v14  ;;  %v789_v10 = vld [vmem:[%s1176_s0 + $0xe0] sm:$0xff]  }
  0x31   :  { %v255_v28 = vadd.f32 %v857_v4, %v187_v20  ;;  %v318_v29 = vmax.f32 %v254_v21, 0.0  ;;  %v189_v30 = vmul.f32 %v852_v1, %v561_v22  ;;  %v565_v31 = vunpack.c.h.bf16 %v783_v14 }
  0x32   :  { %810 = vst [vmem:[%s1179_s3 + $0x90] sm:$0xff] %v695_v24   ;;  %v700_v33 = vpack.c.bf16 %v317_v25, %v316_v19  ;;  %v256_v34 = vadd.f32 %v857_v4, %v188_v26  ;;  %v190_v35 = vmul.f32 %v852_v1, %v564_v27  ;;  %v568_v36 = vunpack.c.l.bf16 %v784_v23 }
  0x33   :  { %v319_v37 = vmax.f32 %v255_v28, 0.0  ;;  %v257_v38 = vadd.f32 %v857_v4, %v189_v30  ;;  %v191_v39 = vmul.f32 %v852_v1, %v565_v31  ;;  %v569_v40 = vunpack.c.h.bf16 %v784_v23  ;;  %v790_v23 = vld [vmem:[%s1176_s0 + $0xe8] sm:$0xff]  }
  0x34   :  { %811 = vst [vmem:[%s1179_s3 + $0x98] sm:$0xff] %v700_v33   ;;  %v320_v41 = vmax.f32 %v256_v34, 0.0  ;;  %v258_v42 = vadd.f32 %v857_v4, %v190_v35  ;;  %v192_v43 = vmul.f32 %v852_v1, %v568_v36  ;;  %v572_v44 = vunpack.c.l.bf16 %v785_v32 }
  0x35   :  { %v705_v46 = vpack.c.bf16 %v319_v37, %v318_v29  ;;  %v321_v47 = vmax.f32 %v257_v38, 0.0  ;;  %v259_v48 = vadd.f32 %v857_v4, %v191_v39  ;;  %v193_v49 = vmul.f32 %v852_v1, %v569_v40 }
  0x36   :  { %v322_v50 = vmax.f32 %v258_v42, 0.0  ;;  %v260_v51 = vadd.f32 %v857_v4, %v192_v43  ;;  %v573_v52 = vunpack.c.h.bf16 %v785_v32  ;;  %v194_v53 = vmul.f32 %v852_v1, %v572_v44  ;;  %v791_v32 = vld [vmem:[%s1176_s0 + $0xf0] sm:$0xff]  }
  0x37   :  { %812 = vst [vmem:[%s1179_s3 + $0xa0] sm:$0xff] %v705_v46   ;;  %v710_v55 = vpack.c.bf16 %v321_v47, %v320_v41  ;;  %v323_v56 = vmax.f32 %v259_v48, 0.0  ;;  %v261_v57 = vadd.f32 %v857_v4, %v193_v49  ;;  %v576_v58 = vunpack.c.l.bf16 %v786_v45  ;;  %v792_v41 = vld [vmem:[%s1176_s0 + $0xf8] sm:$0xff]  }
  0x38   :  { %v324_v59 = vmax.f32 %v260_v51, 0.0  ;;  %v195_v60 = vmul.f32 %v852_v1, %v573_v52  ;;  %v262_v61 = vadd.f32 %v857_v4, %v194_v53  ;;  %v577_v62 = vunpack.c.h.bf16 %v786_v45 }
  0x39   :  { %813 = vst [vmem:[%s1179_s3 + $0xa8] sm:$0xff] %v710_v55   ;;  %v715_v0 = vpack.c.bf16 %v323_v56, %v322_v50  ;;  %v325_v2 = vmax.f32 %v261_v57, 0.0  ;;  %v196_v3 = vmul.f32 %v852_v1, %v576_v58  ;;  %v580_v5 = vunpack.c.l.bf16 %v787_v54 }
  0x3a   :  { %v263_v6 = vadd.f32 %v857_v4, %v195_v60  ;;  %v326_v7 = vmax.f32 %v262_v61, 0.0  ;;  %v197_v8 = vmul.f32 %v852_v1, %v577_v62  ;;  %v581_v9 = vunpack.c.h.bf16 %v787_v54 }
  0x3b   :  { %814 = vst [vmem:[%s1179_s3 + $0xb0] sm:$0xff] %v715_v0   ;;  %v720_v11 = vpack.c.bf16 %v325_v2, %v324_v59  ;;  %v264_v12 = vadd.f32 %v857_v4, %v196_v3  ;;  %v198_v13 = vmul.f32 %v852_v1, %v580_v5  ;;  %v584_v14 = vunpack.c.l.bf16 %v788_v63 }
  0x3c   :  { %v327_v15 = vmax.f32 %v263_v6, 0.0  ;;  %v265_v16 = vadd.f32 %v857_v4, %v197_v8  ;;  %v199_v17 = vmul.f32 %v852_v1, %v581_v9  ;;  %v585_v18 = vunpack.c.h.bf16 %v788_v63 }
  0x3d   :  { %815 = vst [vmem:[%s1179_s3 + $0xb8] sm:$0xff] %v720_v11   ;;  %v328_v19 = vmax.f32 %v264_v12, 0.0  ;;  %v266_v20 = vadd.f32 %v857_v4, %v198_v13  ;;  %v200_v21 = vmul.f32 %v852_v1, %v584_v14  ;;  %v588_v22 = vunpack.c.l.bf16 %v789_v10 }
  0x3e   :  { %v725_v24 = vpack.c.bf16 %v327_v15, %v326_v7  ;;  %v329_v25 = vmax.f32 %v265_v16, 0.0  ;;  %v267_v26 = vadd.f32 %v857_v4, %v199_v17  ;;  %v201_v27 = vmul.f32 %v852_v1, %v585_v18 }
  0x3f   :  { %v330_v28 = vmax.f32 %v266_v20, 0.0  ;;  %v268_v29 = vadd.f32 %v857_v4, %v200_v21  ;;  %v589_v30 = vunpack.c.h.bf16 %v789_v10  ;;  %v202_v31 = vmul.f32 %v852_v1, %v588_v22 }
  0x40   :  { %816 = vst [vmem:[%s1179_s3 + $0xc0] sm:$0xff] %v725_v24   ;;  %v730_v33 = vpack.c.bf16 %v329_v25, %v328_v19  ;;  %v331_v34 = vmax.f32 %v267_v26, 0.0  ;;  %v269_v35 = vadd.f32 %v857_v4, %v201_v27  ;;  %v592_v36 = vunpack.c.l.bf16 %v790_v23 }
  0x41   :  { %v332_v37 = vmax.f32 %v268_v29, 0.0  ;;  %v203_v38 = vmul.f32 %v852_v1, %v589_v30  ;;  %v270_v39 = vadd.f32 %v857_v4, %v202_v31  ;;  %v593_v40 = vunpack.c.h.bf16 %v790_v23 }
  0x42   :  { %817 = vst [vmem:[%s1179_s3 + $0xc8] sm:$0xff] %v730_v33   ;;  %v735_v42 = vpack.c.bf16 %v331_v34, %v330_v28  ;;  %v333_v43 = vmax.f32 %v269_v35, 0.0  ;;  %v204_v44 = vmul.f32 %v852_v1, %v592_v36  ;;  %v596_v45 = vunpack.c.l.bf16 %v791_v32 }
  0x43   :  { %v271_v46 = vadd.f32 %v857_v4, %v203_v38  ;;  %v334_v47 = vmax.f32 %v270_v39, 0.0  ;;  %v205_v48 = vmul.f32 %v852_v1, %v593_v40  ;;  %v597_v49 = vunpack.c.h.bf16 %v791_v32 }
  0x44   :  { %818 = vst [vmem:[%s1179_s3 + $0xd0] sm:$0xff] %v735_v42   ;;  %v740_v50 = vpack.c.bf16 %v333_v43, %v332_v37  ;;  %v272_v51 = vadd.f32 %v857_v4, %v204_v44  ;;  %v206_v52 = vmul.f32 %v852_v1, %v596_v45  ;;  %v600_v53 = vunpack.c.l.bf16 %v792_v41 }
  0x45   :  { %v335_v54 = vmax.f32 %v271_v46, 0.0  ;;  %v273_v55 = vadd.f32 %v857_v4, %v205_v48  ;;  %v207_v56 = vmul.f32 %v852_v1, %v597_v49  ;;  %v601_v57 = vunpack.c.h.bf16 %v792_v41 }
  0x46   :  { %819 = vst [vmem:[%s1179_s3 + $0xd8] sm:$0xff] %v740_v50   ;;  %v336_v58 = vmax.f32 %v272_v51, 0.0  ;;  %v274_v59 = vadd.f32 %v857_v4, %v206_v52  ;;  %v208_v60 = vmul.f32 %v852_v1, %v600_v53 }
  0x47   :  { %v745_v61 = vpack.c.bf16 %v335_v54, %v334_v47  ;;  %v337_v62 = vmax.f32 %v273_v55, 0.0  ;;  %v275_v63 = vadd.f32 %v857_v4, %v207_v56  ;;  %v209_v0 = vmul.f32 %v852_v1, %v601_v57 }
  0x48   :  { %v338_v2 = vmax.f32 %v274_v59, 0.0  ;;  %v276_v3 = vadd.f32 %v857_v4, %v208_v60 }
  0x49   :  { %820 = vst [vmem:[%s1179_s3 + $0xe0] sm:$0xff] %v745_v61   ;;  %v750_v5 = vpack.c.bf16 %v337_v62, %v336_v58  ;;  %v339_v6 = vmax.f32 %v275_v63, 0.0  ;;  %v277_v7 = vadd.f32 %v857_v4, %v209_v0 }
  0x4a   :  { %v340_v8 = vmax.f32 %v276_v3, 0.0 }
  0x4b   :  { %821 = vst [vmem:[%s1179_s3 + $0xe8] sm:$0xff] %v750_v5   ;;  %v755_v9 = vpack.c.bf16 %v339_v6, %v338_v2  ;;  %v341_v10 = vmax.f32 %v277_v7, 0.0 }
  0x4d   :  { %822 = vst [vmem:[%s1179_s3 + $0xf0] sm:$0xff] %v755_v9   ;;  %v760_v1 = vpack.c.bf16 %v341_v10, %v340_v8 }
  0x4f   :  { %823 = vst [vmem:[%s1179_s3 + $0xf8] sm:$0xff] %v760_v1  }

</bundles_post_ra>
